<compile_context>
chip_gen: v7x
topology: tpu7x:2x2x1
jax: 0.10.0
libtpu: 0.0.40
codegen_flags: <defaults>
</compile_context>

<pallas_src>
import jax
import jax.numpy as jnp
from jax.experimental import pallas as pl
from jax.experimental.pallas import tpu as pltpu

EPS = 1e-5  # nn.LayerNorm default (ctor eps is not passed through in the module)


def _residual_ln_sublayer_kernel(x_ref, gamma_ref, beta_ref, wcols_ref, b_ref, o_ref):
    # x_ref / o_ref: (1, C, TN) block, channel-major (native NCHW) layout.
    # gamma/beta/b : (C, 1) ; wcols: (C, C, 1) with wcols[k] == W[k, :] as a column.
    x = x_ref[0].astype(jnp.float32)                       # (C, TN)
    C = x.shape[0]

    # --- LayerNorm over the channel (sublane) axis, biased variance, eps=1e-5 ---
    mean = jnp.mean(x, axis=0, keepdims=True)              # (1, TN)
    centered = x - mean
    var = jnp.mean(centered * centered, axis=0, keepdims=True)
    normed = centered * jax.lax.rsqrt(var + EPS)           # (C, TN)

    gamma = gamma_ref[...].astype(jnp.float32)             # (C, 1) lane-broadcast
    beta = beta_ref[...].astype(jnp.float32)
    y = normed * gamma + beta                              # affine LN

    # --- sublayer: pointwise (1x1 conv) channel mixing on the VPU ---
    # z[j, n] = sum_k W[k, j] * y[k, n] + b[j]  (== (y_tok @ W + b) in token layout)
    # Unrolled FMAs beat the MXU for tiny C (MXU would pad C=4 up to 128/256).
    # TODO(synk): for large C (>= 128) switch this to jnp.dot on the MXU.
    acc = wcols_ref[0].astype(jnp.float32) * y[0:1, :]     # (C,1)*(1,TN) -> (C,TN)
    for k in range(1, C):
        acc = acc + wcols_ref[k].astype(jnp.float32) * y[k:k + 1, :]
    z = acc + b_ref[...].astype(jnp.float32)

    # --- dropout(p=0.0) == identity ; residual add ---
    # TODO(synk): training-mode dropout (p>0) would need pltpu.prng_* masking here.
    o_ref[0] = (x + z).astype(o_ref.dtype)


def _pick_tile(n, target=512):
    """Largest multiple of 128 <= target that divides n (or full n if n % 128 != 0)."""
    if n % 128 != 0:
        return n
    tn = min(target, n)
    tn -= tn % 128
    while n % tn != 0:
        tn -= 128
    return tn


def residual_connection(x_nchw, gamma, beta, w, b, *, tn_target=512):
    """x_nchw: (B, C, H, W). Returns x + sublayer(channel-LN(x)), same shape/dtype."""
    B, C, H, W = x_nchw.shape
    N = H * W
    TN = _pick_tile(N, tn_target)
    grid = (B, N // TN)

    # Free reshapes only — no HBM transposes; kernel works channel-major.
    x_cn = x_nchw.reshape(B, C, N)
    gamma_col = gamma.reshape(C, 1)
    beta_col = beta.reshape(C, 1)
    b_col = b.reshape(C, 1)
    w_cols = w.reshape(C, C, 1)          # w_cols[k] = W[k, :] as a (C, 1) column

    itemsize = jnp.dtype(x_nchw.dtype).itemsize
    cost = pl.CostEstimate(
        flops=2 * B * N * C * C + 10 * B * N * C,
        transcendentals=B * N,
        bytes_accessed=2 * B * C * N * itemsize + (C * C + 3 * C) * 4,
    )

    out_cn = pl.pallas_call(
        _residual_ln_sublayer_kernel,
        out_shape=jax.ShapeDtypeStruct((B, C, N), x_nchw.dtype),
        grid_spec=pltpu.PrefetchScalarGridSpec(
            num_scalar_prefetch=0,
            grid=grid,
            in_specs=[
                pl.BlockSpec((1, C, TN), lambda bi, ni: (bi, 0, ni)),  # x
                pl.BlockSpec((C, 1), lambda bi, ni: (0, 0)),           # gamma
                pl.BlockSpec((C, 1), lambda bi, ni: (0, 0)),           # beta
                pl.BlockSpec((C, C, 1), lambda bi, ni: (0, 0, 0)),     # w columns
                pl.BlockSpec((C, 1), lambda bi, ni: (0, 0)),           # b
            ],
            out_specs=pl.BlockSpec((1, C, TN), lambda bi, ni: (bi, 0, ni)),
        ),
        compiler_params=pltpu.CompilerParams(
            dimension_semantics=("parallel", "parallel"),
            vmem_limit_bytes=32 * 1024 * 1024,
        ),
        cost_estimate=cost,
    )(x_cn, gamma_col, beta_col, w_cols, b_col)

    return out_cn.reshape(B, C, H, W)


def _reference(x_nchw, gamma, beta, w, b):
    B, C, H, W = x_nchw.shape
    xt = jnp.transpose(x_nchw.reshape(B, C, H * W), (0, 2, 1)).astype(jnp.float32)
    mean = jnp.mean(xt, axis=-1, keepdims=True)
    var = jnp.mean((xt - mean) ** 2, axis=-1, keepdims=True)
    y = (xt - mean) / jnp.sqrt(var + EPS) * gamma + beta
    z = y @ w + b
    out = xt + z
    return jnp.transpose(out, (0, 2, 1)).reshape(B, C, H, W).astype(x_nchw.dtype)


if __name__ == "__main__":
    key = jax.random.PRNGKey(0)
    k_x, k_w, k_b = jax.random.split(key, 3)

    B, C, H, W = 2, 4, 16, 16
    x = jax.random.normal(k_x, (B, C, H, W), dtype=jnp.float32)

    # nn.LayerNorm default init: weight=1, bias=0.
    gamma = jnp.ones((C,), dtype=jnp.float32)
    beta = jnp.zeros((C,), dtype=jnp.float32)
    # Synthetic deterministic sublayer params (1x1-conv style channel mixing).
    w = jax.random.normal(k_w, (C, C), dtype=jnp.float32) * 0.1
    b = jax.random.normal(k_b, (C,), dtype=jnp.float32) * 0.1

    out = residual_connection(x, gamma, beta, w, b)
    out = jax.block_until_ready(out)

    ref = _reference(x, gamma, beta, w, b)
    assert out.shape == x.shape and out.dtype == x.dtype
    assert jnp.allclose(out, ref, atol=1e-4, rtol=1e-4)

    print("KERNEL_OK")
</pallas_src>

<mosaic_0001>
module attributes {stable_mosaic.version = 11 : i64} {
  func.func @_residual_ln_sublayer_kernel(%arg0: i32, %arg1: i32, %arg2: memref<1x4x256xf32, #tpu.memory_space<vmem>>, %arg3: memref<4x1xf32, #tpu.memory_space<vmem>>, %arg4: memref<4x1xf32, #tpu.memory_space<vmem>>, %arg5: memref<4x4x1xf32, #tpu.memory_space<vmem>>, %arg6: memref<4x1xf32, #tpu.memory_space<vmem>>, %arg7: memref<1x4x256xf32, #tpu.memory_space<vmem>>) attributes {dimension_semantics = [#tpu.dimension_semantics<parallel>, #tpu.dimension_semantics<parallel>], iteration_bounds = array<i64: 2, 1>, scalar_prefetch = 0 : i64, scratch_operands = 0 : i64, tpu.core_type = #tpu.core_type<tc>, window_params = [{transform_indices = @transform_0, window_bounds = array<i64: 1, 4, 256>}, {pipeline_mode = #tpu.pipeline_mode<synchronous>, transform_indices = @transform_1, window_bounds = array<i64: 4, 1>}, {pipeline_mode = #tpu.pipeline_mode<synchronous>, transform_indices = @transform_2, window_bounds = array<i64: 4, 1>}, {pipeline_mode = #tpu.pipeline_mode<synchronous>, transform_indices = @transform_3, window_bounds = array<i64: 4, 4, 1>}, {pipeline_mode = #tpu.pipeline_mode<synchronous>, transform_indices = @transform_4, window_bounds = array<i64: 4, 1>}, {transform_indices = @transform_5, window_bounds = array<i64: 1, 4, 256>}]} {
    %c0 = arith.constant 0 : index
    %c0_0 = arith.constant 0 : index
    %c0_1 = arith.constant 0 : index
    %0 = vector.load %arg2[%c0, %c0_0, %c0_1] : memref<1x4x256xf32, #tpu.memory_space<vmem>>, vector<1x4x256xf32>
    %1 = vector.shape_cast %0 : vector<1x4x256xf32> to vector<4x256xf32>
    %cst = arith.constant dense<0.000000e+00> : vector<256xf32>
    %2 = vector.multi_reduction <add>, %1, %cst [0] : vector<4x256xf32> to vector<256xf32>
    %3 = vector.shape_cast %2 : vector<256xf32> to vector<1x256xf32>
    %cst_2 = arith.constant 4.000000e+00 : f32
    %4 = vector.broadcast %cst_2 : f32 to vector<1x256xf32>
    %5 = arith.divf %3, %4 : vector<1x256xf32>
    %6 = vector.broadcast %5 : vector<1x256xf32> to vector<4x256xf32>
    %7 = arith.subf %1, %6 : vector<4x256xf32>
    %8 = arith.mulf %7, %7 : vector<4x256xf32>
    %cst_3 = arith.constant dense<0.000000e+00> : vector<256xf32>
    %9 = vector.multi_reduction <add>, %8, %cst_3 [0] : vector<4x256xf32> to vector<256xf32>
    %10 = vector.shape_cast %9 : vector<256xf32> to vector<1x256xf32>
    %cst_4 = arith.constant 4.000000e+00 : f32
    %11 = vector.broadcast %cst_4 : f32 to vector<1x256xf32>
    %12 = arith.divf %10, %11 : vector<1x256xf32>
    %cst_5 = arith.constant 9.99999974E-6 : f32
    %13 = vector.broadcast %cst_5 : f32 to vector<1x256xf32>
    %14 = arith.addf %12, %13 : vector<1x256xf32>
    %15 = math.rsqrt %14 : vector<1x256xf32>
    %16 = vector.broadcast %15 : vector<1x256xf32> to vector<4x256xf32>
    %17 = arith.mulf %7, %16 : vector<4x256xf32>
    %c0_6 = arith.constant 0 : index
    %c0_7 = arith.constant 0 : index
    %18 = vector.load %arg3[%c0_6, %c0_7] : memref<4x1xf32, #tpu.memory_space<vmem>>, vector<4x1xf32>
    %c0_8 = arith.constant 0 : index
    %c0_9 = arith.constant 0 : index
    %19 = vector.load %arg4[%c0_8, %c0_9] : memref<4x1xf32, #tpu.memory_space<vmem>>, vector<4x1xf32>
    %20 = vector.broadcast %18 : vector<4x1xf32> to vector<4x256xf32>
    %21 = arith.mulf %17, %20 : vector<4x256xf32>
    %22 = vector.broadcast %19 : vector<4x1xf32> to vector<4x256xf32>
    %23 = arith.addf %21, %22 : vector<4x256xf32>
    %c0_10 = arith.constant 0 : index
    %c0_11 = arith.constant 0 : index
    %c0_12 = arith.constant 0 : index
    %24 = vector.load %arg5[%c0_10, %c0_11, %c0_12] : memref<4x4x1xf32, #tpu.memory_space<vmem>>, vector<1x4x1xf32>
    %25 = vector.shape_cast %24 : vector<1x4x1xf32> to vector<4x1xf32>
    %26 = vector.extract_strided_slice %23 {offsets = [0, 0], sizes = [1, 256], strides = [1, 1]} : vector<4x256xf32> to vector<1x256xf32>
    %27 = vector.broadcast %25 : vector<4x1xf32> to vector<4x256xf32>
    %28 = vector.broadcast %26 : vector<1x256xf32> to vector<4x256xf32>
    %29 = arith.mulf %27, %28 : vector<4x256xf32>
    %c1 = arith.constant 1 : index
    %c0_13 = arith.constant 0 : index
    %c0_14 = arith.constant 0 : index
    %30 = vector.load %arg5[%c1, %c0_13, %c0_14] : memref<4x4x1xf32, #tpu.memory_space<vmem>>, vector<1x4x1xf32>
    %31 = vector.shape_cast %30 : vector<1x4x1xf32> to vector<4x1xf32>
    %32 = vector.extract_strided_slice %23 {offsets = [1, 0], sizes = [1, 256], strides = [1, 1]} : vector<4x256xf32> to vector<1x256xf32>
    %33 = vector.broadcast %31 : vector<4x1xf32> to vector<4x256xf32>
    %34 = vector.broadcast %32 : vector<1x256xf32> to vector<4x256xf32>
    %35 = arith.mulf %33, %34 : vector<4x256xf32>
    %36 = arith.addf %29, %35 : vector<4x256xf32>
    %c2 = arith.constant 2 : index
    %c0_15 = arith.constant 0 : index
    %c0_16 = arith.constant 0 : index
    %37 = vector.load %arg5[%c2, %c0_15, %c0_16] : memref<4x4x1xf32, #tpu.memory_space<vmem>>, vector<1x4x1xf32>
    %38 = vector.shape_cast %37 : vector<1x4x1xf32> to vector<4x1xf32>
    %39 = vector.extract_strided_slice %23 {offsets = [2, 0], sizes = [1, 256], strides = [1, 1]} : vector<4x256xf32> to vector<1x256xf32>
    %40 = vector.broadcast %38 : vector<4x1xf32> to vector<4x256xf32>
    %41 = vector.broadcast %39 : vector<1x256xf32> to vector<4x256xf32>
    %42 = arith.mulf %40, %41 : vector<4x256xf32>
    %43 = arith.addf %36, %42 : vector<4x256xf32>
    %c3 = arith.constant 3 : index
    %c0_17 = arith.constant 0 : index
    %c0_18 = arith.constant 0 : index
    %44 = vector.load %arg5[%c3, %c0_17, %c0_18] : memref<4x4x1xf32, #tpu.memory_space<vmem>>, vector<1x4x1xf32>
    %45 = vector.shape_cast %44 : vector<1x4x1xf32> to vector<4x1xf32>
    %46 = vector.extract_strided_slice %23 {offsets = [3, 0], sizes = [1, 256], strides = [1, 1]} : vector<4x256xf32> to vector<1x256xf32>
    %47 = vector.broadcast %45 : vector<4x1xf32> to vector<4x256xf32>
    %48 = vector.broadcast %46 : vector<1x256xf32> to vector<4x256xf32>
    %49 = arith.mulf %47, %48 : vector<4x256xf32>
    %50 = arith.addf %43, %49 : vector<4x256xf32>
    %c0_19 = arith.constant 0 : index
    %c0_20 = arith.constant 0 : index
    %51 = vector.load %arg6[%c0_19, %c0_20] : memref<4x1xf32, #tpu.memory_space<vmem>>, vector<4x1xf32>
    %52 = vector.broadcast %51 : vector<4x1xf32> to vector<4x256xf32>
    %53 = arith.addf %50, %52 : vector<4x256xf32>
    %54 = arith.addf %1, %53 : vector<4x256xf32>
    %c0_21 = arith.constant 0 : index
    %c0_22 = arith.constant 0 : index
    %c0_23 = arith.constant 0 : index
    %55 = vector.load %arg7[%c0_21, %c0_22, %c0_23] : memref<1x4x256xf32, #tpu.memory_space<vmem>>, vector<1x4x256xf32>
    %56 = vector.shape_cast %55 : vector<1x4x256xf32> to vector<4x256xf32>
    %57 = vector.shape_cast %54 : vector<4x256xf32> to vector<1x4x256xf32>
    tpu.vector_store %arg7[%c0_21, %c0_22, %c0_23], %57 {strides = array<i32>} : memref<1x4x256xf32, #tpu.memory_space<vmem>>, vector<1x4x256xf32>,
    return
  }
  func.func @transform_0(%arg0: i32, %arg1: i32) -> (i32, i32, i32) {
    %c0_i32 = arith.constant 0 : i32
    %c0_i32_0 = arith.constant 0 : i32
    return %arg0, %c0_i32, %arg1 : i32, i32, i32
  }
  func.func @transform_1(%arg0: i32, %arg1: i32) -> (i32, i32) {
    %c0_i32 = arith.constant 0 : i32
    %c0_i32_0 = arith.constant 0 : i32
    %c0_i32_1 = arith.constant 0 : i32
    return %c0_i32, %c0_i32_0 : i32, i32
  }
  func.func @transform_2(%arg0: i32, %arg1: i32) -> (i32, i32) {
    %c0_i32 = arith.constant 0 : i32
    %c0_i32_0 = arith.constant 0 : i32
    %c0_i32_1 = arith.constant 0 : i32
    return %c0_i32, %c0_i32_0 : i32, i32
  }
  func.func @transform_3(%arg0: i32, %arg1: i32) -> (i32, i32, i32) {
    %c0_i32 = arith.constant 0 : i32
    %c0_i32_0 = arith.constant 0 : i32
    %c0_i32_1 = arith.constant 0 : i32
    %c0_i32_2 = arith.constant 0 : i32
    return %c0_i32, %c0_i32_0, %c0_i32_1 : i32, i32, i32
  }
  func.func @transform_4(%arg0: i32, %arg1: i32) -> (i32, i32) {
    %c0_i32 = arith.constant 0 : i32
    %c0_i32_0 = arith.constant 0 : i32
    %c0_i32_1 = arith.constant 0 : i32
    return %c0_i32, %c0_i32_0 : i32, i32
  }
  func.func @transform_5(%arg0: i32, %arg1: i32) -> (i32, i32, i32) {
    %c0_i32 = arith.constant 0 : i32
    %c0_i32_0 = arith.constant 0 : i32
    return %arg0, %c0_i32, %arg1 : i32, i32, i32
  }
}

</mosaic_0001>

<bundles_post_ra>
// kernel: tpu_custom_call.1
= control target key start
LH: loop header
LB: loop body
LE: loop exit
PB: predicated region body
PF: predicated region fallthrough
CT: control target
= control target key end

     0   :  { %10 = vsyncpa [#allocation3], 0  ;;  %s898_s0 = inlined_call_operand.vmem [shape: f32[2,4,256], index: 0, kind: input, shape index: {}]   ;;  %s899_s1 = inlined_call_operand.vmem [shape: f32[4,1], index: 1, kind: input, shape index: {}]   ;;  %s900_s2 = inlined_call_operand.vmem [shape: f32[4,1], index: 2, kind: input, shape index: {}]   ;;  %s901_s3 = inlined_call_operand.vmem [shape: f32[4,4,1], index: 3, kind: input, shape index: {}]   ;;  %s902_s4 = inlined_call_operand.vmem [shape: f32[4,1], index: 4, kind: input, shape index: {}]   ;;  %s903_s5 = inlined_call_operand.hbm [shape: f32[2,4,256], index: 5, kind: output, shape index: {}]  }
   0x1   :  { %12 = vsyncpa [#allocation3 + $0x1], 0  ;;  %s754_s18 = smov 0   ;;  %s756_s19 = smov 0  }
   0x2   :  { %s758_s20 = smov 0   ;;  %s760_s21 = smov 0  }
   0x3   :  { %s762_s22 = smov 0   ;;  %s764_s23 = smov 0  }
   0x4 LB: > { %s559_s24 = sadd.s32 4294967295, %s719_s23   ;;  %s560_s25 = sadd.s32 4294967294, %s719_s23   ;;  %s719_s23 = sphi %s764_s23, %s18_s23   ;;  %s715_s22 = sphi %s762_s22, %s910_s22   ;;  %s711_s21 = sphi %s760_s21, %s909_s21   ;;  %s707_s20 = sphi %s758_s20, %s908_s20   ;;  %s703_s19 = sphi %s756_s19, %s907_s19   ;;  %s699_s18 = sphi %s754_s18, %s906_s18  }
   0x5   : > { %s30_s26 = sadd.s32 1, %s715_s22  ;;  %s151_s27 = sadd.s32 1, %s707_s20 }
   0x6   : > { %p32_p0 = scmp.ge.s32.totalorder %s30_s26, 2  ;;  %p161_p1 = scmp.ne.s32.totalorder %s707_s20, %s703_s19 }
   0x7   : > { %p162_p2 = scmp.eq.s32.totalorder %s559_s24, 1  ;;  %p167_p3 = scmp.ne.s32.totalorder %s703_s19, %s699_s18 }
   0x8   : > { %s912_s26 = smov (%p32_p0, %s30_s26), 0  ;;  %p168_p5 = scmp.eq.s32.totalorder %s560_s25, 1 }
   0x9   : > { %p794_p4 = por %p162_p2, %p161_p1  ;;  %s146_s29 = ssub.s32 %s715_s22, %s912_s26 }
   0xa   : > { %p563_p6 = scmp.ge.s32.totalorder %s719_s23, 1  ;;  %p149_p7 = scmp.eq.s32.totalorder %s146_s29, 0 }
   0xb   : > { %p801_p8 = por %p168_p5, %p167_p3  ;;  %p211_p9 = scmp.lt.s32.totalorder %s719_s23, 3 }
   0xc   : > { %s807_s6 = scalar_select %p149_p7, %s707_s20, %s151_s27  }
   0xd   : > { %p212_p10 = pnand %p563_p6, %p211_p9 }
   0xe   : > { %v338_v0 = vld [vmem:[%s901_s3] sm:$0xf] (!%p212_p10)  ;;  %v721_v2 = vmov (!%p212_p10), 0   ;;  %v567_v3 = vld [vmem:[%s901_s3 + $0x4] sm:$0xf] (!%p212_p10)  ;;  %p244_p11 = scmp.lt.s32.totalorder (!%p212_p10), %s711_s21, 1  ;;  %v319_v50 = vlaneseq (!%p212_p10) }
   0xf   : > { %215 = sbr.rel (%p212_p10) target bundleno = 185 (0xb9), region = 40  ;;  %v310_v1 = vld [vmem:[%s899_s1] sm:$0xf] (!%p212_p10)  ;;  %635 = vset.pattern.permute.xlu1 (!%p212_p10), %v721_v2  ;;  %634 = vset.pattern.permute.xlu0 (!%p212_p10), %v721_v2  ;;  %v569_v5 = vld [vmem:[%s901_s3 + $0xc] sm:$0xf] (!%p212_p10)  ;;  %vm258_vm0 = vcmask (!%p212_p10), 1043456  }
  0x10   : > { %341 = vperm.xlu1 (!%p212_p10), %635, %v338_v0   ;;  %314 = vperm.xlu0 (!%p212_p10), %634, %v310_v1   ;;  %v311_v4 = vld [vmem:[%s900_s2] sm:$0xf] (!%p212_p10)  ;;  %v568_v6 = vld [vmem:[%s901_s3 + $0x8] sm:$0xf] (!%p212_p10)  ;;  %v722_v48 = vmov (!%p212_p10), 839922192  }
  0x11   : > { %v452_v7 = vld [vmem:[%s902_s4] sm:$0xf] (!%p212_p10)  ;;  %v317_v49 = vunpack.c.l.s4 (!%p212_p10), %v722_v48  ;;  %v320_v53 = vshrl.u32 (!%p212_p10), %v319_v50, 7  ;;  %s240_s11 = sand.u32 (!%p212_p10), 1, %s703_s19   ;;  %s576_s13 = sshll.u32 (!%p212_p10), %s711_s21, 7 }
  0x12   : > { %s564_s12 = sshll.u32 (!%p212_p10), %s240_s11, 3  ;;  %s851_s24 = scalar_lea.hbm (!%p212_p10), %s903_s5, %s576_s13 }
  0x13   : > { %v318_v52 = vunpack.c.0.s8 (!%p212_p10), %v317_v49  ;;  %v432_v61 = vsub.s32 (!%p212_p10), 3, %v320_v53  ;;  %v436_v62 = vsub.s32 (!%p212_p10), 7, %v320_v53  ;;  %v347_v2 = vsub.s32 (!%p212_p10), 0, %v320_v53  ;;  %s242_s14 = scalar_lea.vmem (!%p212_p10), [#allocation2], %s564_s12  ;;  %s467_s25 = scalar_lea.sflag (!%p212_p10), [#allocation3], %s240_s11 }
  0x14   : > { %369 = vperm.xlu1 (!%p212_p10), %635, %v567_v3   ;;  %327 = vperm.xlu0 (!%p212_p10), %634, %v311_v4   ;;  %v351_v3 = vsub.s32 (!%p212_p10), 4, %v320_v53  ;;  %v374_v4 = vsub.s32 (!%p212_p10), 1, %v320_v53  ;;  %s483_s15 = sshll.u32 (!%p212_p10), %s242_s14, 4  ;;  %s853_s15 = int_to_ptr.vmem [resolvable:$true] %s483_s15 }
  0x15   : > { %v321_v55 = vsub.s32 (!%p212_p10), %v318_v52, %v320_v53  ;;  %s641_s27 = scalar_lea.vmem (!%p212_p10), %s853_s15, 128 }
  0x16   : > { %s245_s29 = scalar_select %p244_p11, %s711_s21, 1 }
  0x17   : > { %p642_p12 = scmp.ne.s32.totalorder %s853_s15, %s641_s27  ;;  %s723_s21 = smov [#allocation2]  }
  0x18   : > { %427 = vperm.xlu1 %635, %v569_v5   ;;  %398 = vperm.xlu0 %634, %v568_v6   ;;  %s575_s7 = sshll.u32 %s245_s29, 3  ;;  %v378_v5 = vsub.s32 5, %v320_v53  ;;  %v403_v6 = vsub.s32 2, %v320_v53  ;;  %s645_s29 = sshll.u32 %s723_s21, 4  ;;  %s646_s29 = int_to_ptr.vmem [resolvable:$false] %s645_s29 }
  0x19   : > { %s251_s10 = scalar_lea.vmem %s898_s0, %s575_s7  ;;  %p643_p13 = pnand %p642_p12, %p794_p4 }
  0x1a   : > { %v835_v8 = vld [vmem:[%s251_s10] sm:$0xff]  ;;  %s647_s7 = scalar_lea.vmem %s646_s29, 256  ;;  %p648_p1 = scmp.lt.s32.totalorder %s853_s15, %s646_s29 }
  0x1b   : > { %v256_v9 = vcombine.high %v835_v8, %v835_v8  ;;  %v259_v10 = vsel %vm258_vm0, %v835_v8, 0.0  ;;  %p644_p0 = pneg %p643_p13  ;;  %p649_p2 = scmp.lt.s32.totalorder %s647_s7, %s641_s27 }
  0x1c   : > { %455 = vperm.xlu0 %634, %v452_v7   ;;  %v260_v12 = vrot.slane %v259_v10, 4  ;;  %v407_v7 = vsub.s32 6, %v320_v53 }
  0x1d   : > { %v266_v11 = vsel %vm258_vm0, %v256_v9, 0.0  ;;  %p650_p3 = por %p649_p2, %p648_p1 }
  0x1e   : > { %v267_v13 = vrot.slane %v266_v11, 4  ;;  %v261_v14 = vadd.f32 %v260_v12, %v259_v10 }
  0x1f   : > { %p651_p5 = pnand %p650_p3, %p644_p0 }
  0x20   : > { %v268_v15 = vadd.f32 %v267_v13, %v266_v11  ;;  %v262_v16 = vrot.slane %v261_v14, 2 }
  0x22   : > { %v269_v17 = vrot.slane %v268_v15, 2  ;;  %v263_v18 = vadd.f32 %v262_v16, %v261_v14 }
  0x24   : > { %v270_v19 = vadd.f32 %v269_v17, %v268_v15  ;;  %v264_v20 = vrot.slane %v263_v18, 1 }
  0x26   : > { %v271_v21 = vrot.slane %v270_v19, 1  ;;  %v265_v22 = vadd.f32 %v264_v20, %v263_v18 }
  0x28   : > { %v272_v23 = vadd.f32 %v271_v21, %v270_v19  ;;  %v274_v24 = vmul.f32 0.25, %v265_v22 }
  0x2a   : > { %v275_v25 = vmul.f32 0.25, %v272_v23 }
  0x2c   : > { %v278_v26 = vcombine.low %v274_v24, %v275_v25 }
  0x2e   : > { %v280_v27 = vsub.f32 %v835_v8, %v278_v26 }
  0x30   : > { %v281_v28 = vmul.f32 %v280_v27, %v280_v27 }
  0x32   : > { %v283_v29 = vcombine.high %v281_v28, %v281_v28  ;;  %v285_v30 = vsel %vm258_vm0, %v281_v28, 0.0 }
  0x33   : > { %v286_v32 = vrot.slane %v285_v30, 4 }
  0x34   : > { %v292_v31 = vsel %vm258_vm0, %v283_v29, 0.0 }
  0x35   : > { %v293_v33 = vrot.slane %v292_v31, 4  ;;  %v287_v34 = vadd.f32 %v286_v32, %v285_v30 }
  0x37   : > { %v294_v35 = vadd.f32 %v293_v33, %v292_v31  ;;  %v288_v36 = vrot.slane %v287_v34, 2 }
  0x39   : > { %v295_v37 = vrot.slane %v294_v35, 2  ;;  %v289_v38 = vadd.f32 %v288_v36, %v287_v34 }
  0x3b   : > { %v296_v39 = vadd.f32 %v295_v37, %v294_v35  ;;  %v290_v40 = vrot.slane %v289_v38, 1 }
  0x3d   : > { %v297_v41 = vrot.slane %v296_v39, 1  ;;  %v291_v42 = vadd.f32 %v290_v40, %v289_v38 }
  0x3f   : > { %v298_v43 = vadd.f32 %v297_v41, %v296_v39  ;;  %v299_v44 = vmul.f32 0.25, %v291_v42 }
  0x41   : > { %v300_v45 = vmul.f32 0.25, %v298_v43  ;;  %v301_v46 = vadd.f32 1e-05, %v299_v44 }
  0x43   : > { %v302_v47 = vadd.f32 1e-05, %v300_v45  ;;  %637 = vrsqrt.f32 %v301_v46 }
  0x45   : > { %639 = vrsqrt.f32 %v302_v47 }
  0x4d   : > { %v638_v51 = vpop.eup %637 }
  0x4f   : > { %v640_v54 = vpop.eup %639 }
  0x50   : > { %v307_v56 = vcombine.low %v638_v51, %v640_v54 }
  0x52   : > { %v309_v58 = vmul.f32 %v307_v56, %v280_v27 }
  0x8f   : > { %v315_v57 = vpop.permute.xlu0 %314  ;;  %v342_v63 = vpop.permute.xlu1 %341 }
  0x90   : > { %v322_v59 = vrot.slane %v315_v57, %v321_v55 }
  0x92   : > { %v324_v0 = vmul.f32 %v322_v59, %v309_v58 }
  0x93   : > { %v328_v60 = vpop.permute.xlu0 %327  ;;  %v370_v18 = vpop.permute.xlu1 %369 }
  0x94   : > { %v335_v1 = vrot.slane %v328_v60, %v321_v55 }
  0x96   : > { %v337_v9 = vadd.f32 %v335_v1, %v324_v0 }
  0x97   : > { %v399_v31 = vpop.permute.xlu0 %398  ;;  %v428_v36 = vpop.permute.xlu1 %427 }
  0x98   : > { %v433_v10 = vrot.slane %v337_v9, %v432_v61  ;;  %v437_v11 = vrot.slane %v337_v9, %v436_v62  ;;  %v348_v12 = vrot.slane %v337_v9, %v347_v2  ;;  %v352_v13 = vrot.slane %v337_v9, %v351_v3 }
  0x99   : > { %v375_v14 = vrot.slane %v337_v9, %v374_v4  ;;  %v379_v15 = vrot.slane %v337_v9, %v378_v5  ;;  %v404_v16 = vrot.slane %v337_v9, %v403_v6  ;;  %v408_v17 = vrot.slane %v337_v9, %v407_v7 }
  0x9a   : > { %v358_v19 = vrot.slane %v348_v12, %v347_v2  ;;  %v362_v20 = vrot.slane %v352_v13, %v347_v2  ;;  %v443_v27 = vrot.slane %v433_v10, %v432_v61  ;;  %v447_v28 = vrot.slane %v437_v11, %v432_v61 }
  0x9b   : > { %v385_v21 = vrot.slane %v375_v14, %v374_v4  ;;  %v389_v22 = vrot.slane %v379_v15, %v374_v4  ;;  %v414_v23 = vrot.slane %v404_v16, %v403_v6  ;;  %v418_v24 = vrot.slane %v408_v17, %v403_v6  ;;  %v456_v43 = vpop.permute.xlu0 %455 }
  0x9c   : > { %v363_v25 = vmul.f32 %v358_v19, %v342_v63  ;;  %v364_v26 = vmul.f32 %v362_v20, %v342_v63  ;;  %v448_v37 = vmul.f32 %v443_v27, %v428_v36  ;;  %v449_v38 = vmul.f32 %v447_v28, %v428_v36 }
  0x9d   : > { %v390_v29 = vmul.f32 %v385_v21, %v370_v18  ;;  %v391_v30 = vmul.f32 %v389_v22, %v370_v18  ;;  %v419_v34 = vmul.f32 %v414_v23, %v399_v31  ;;  %v420_v35 = vmul.f32 %v418_v24, %v399_v31 }
  0x9f   : > { %v392_v32 = vadd.f32 %v390_v29, %v363_v25  ;;  %v393_v33 = vadd.f32 %v391_v30, %v364_v26 }
  0xa1   : > { %v421_v39 = vadd.f32 %v419_v34, %v392_v32  ;;  %v422_v40 = vadd.f32 %v420_v35, %v393_v33 }
  0xa3   : > { %v450_v41 = vadd.f32 %v448_v37, %v421_v39  ;;  %v451_v42 = vadd.f32 %v449_v38, %v422_v40 }
  0xa5   : > { %v458_v44 = vadd.f32 %v456_v43, %v450_v41  ;;  %v459_v45 = vadd.f32 %v456_v43, %v451_v42 }
  0xa7   : > { %v462_v46 = vcombine.low %v458_v44, %v459_v45 }
  0xa9   : > { %v464_v47 = vadd.f32 %v462_v46, %v835_v8 }
  0xab   : > { %465 = vst [vmem:[%s242_s14] sm:$0xff] %v464_v47 }
  0xac   : > { %654 = shalt.err (!%p651_p5)
}
  0xad   : > { %s655_s8 = scalar_lea.hbm %s851_s24, 128  ;;  %s659_s11 = scalar_lea.hbm %s903_s5, 256 }
  0xae   : > { %p656_p6 = scmp.ne.s32.totalorder %s851_s24, %s655_s8  ;;  %p660_p10 = scmp.lt.u32.totalorder %s851_s24, %s903_s5 }
  0xaf   : > { %p661_p11 = scmp.lt.u32.totalorder %s659_s11, %s655_s8  ;;  %p663_p13 = scmp.lt.u32.totalorder %s655_s8, %s851_s24 }
  0xb0   : > { %p657_p7 = pnand %p656_p6, %p794_p4 }
  0xb1   : > { %p662_p12 = por %p661_p11, %p660_p10 }
  0xb2   : > { %p658_p9 = pneg %p657_p7 }
  0xb3   : > { %p664_p0 = por %p663_p13, %p662_p12 }
  0xb5   : > { %p665_p1 = pnand %p664_p0, %p658_p9 }
  0xb7   : > { %668 = shalt.err (!%p665_p1)
}
  0xb8   : > { %577 = dma.vmem_to_hbm [thread:$0]  (%p794_p4), %s853_s15, 128, %s851_s24, %s467_s25  }
  0xb9 PF: > { %p583_p2 = scmp.ge.s32.totalorder %s719_s23, 2  ;;  %s495_s14 = sand.u32 1, %s699_s18  }
  0xba   : > { %s496_s16 = scalar_lea.sflag [#allocation3], %s495_s14 }
  0xbb   : > { %p580_p3 = pnand %p583_p2, %p801_p8 }
  0xbd   : > { %694 = dma.done.wait (!%p580_p3), %s496_s16, 128  }
  0xbe   : > { %696 = vsyncadd (!%p580_p3), %s496_s16, 4294967168  ;;  %s18_s23 = sadd.s32 1, %s719_s23   ;;  %s906_s18 = smov %s703_s19 }
  0xbf   : > { %p15_p5 = scmp.ge.s32.totalorder %s18_s23, 4   ;;  %s907_s19 = smov %s707_s20 }
  0xc0   : > { %s908_s20 = smov %s807_s6  ;;  %s909_s21 = smov %s715_s22 }
  0xc1   : > { %s910_s22 = smov %s912_s26  ;;  %17 = sbr.rel (!%p15_p5) target bundleno = 4 (0x4), region = 78 }
  0xc8   :  { %501 = vsyncpa [#allocation3], 1 }
  0xc9   :  { %503 = vsyncpa [#allocation3 + $0x1], 1 }

</bundles_post_ra>
